<compile_context>
chip_gen: v7x
topology: tpu7x:2x2x1
jax: 0.10.0
libtpu: 0.0.40
codegen_flags: <defaults>
</compile_context>

<pallas_src>
from functools import partial

import jax
import jax.numpy as jnp
from jax import lax
from jax.experimental import pallas as pl
from jax.experimental.pallas import tpu as pltpu

# Scoped-VMEM request: above the 16/32 MiB defaults, below v7x's 64 MiB physical.
_VMEM_LIMIT_BYTES = 48 * 1024 * 1024


def _pick_tile(dim, target, align):
    """Largest multiple of `align` that divides `dim` and is <= target; else the full dim."""
    if dim <= target:
        return dim
    t = (target // align) * align
    while t >= align:
        if dim % t == 0:
            return t
        t -= align
    return dim


# ---------------------------------------------------------------------------
# Tiled linear (x @ w + b) with K-reduction accumulator
# ---------------------------------------------------------------------------
def _linear_kernel(x_ref, w_ref, b_ref, o_ref, acc_ref):
    k = pl.program_id(2)

    @pl.when(k == 0)
    def _init():
        acc_ref[...] = jnp.zeros_like(acc_ref)

    acc_ref[...] += jnp.dot(x_ref[...], w_ref[...],
                            preferred_element_type=jnp.float32)

    @pl.when(k == pl.num_programs(2) - 1)
    def _finalize():
        o_ref[...] = (acc_ref[...] + b_ref[...].astype(jnp.float32)).astype(o_ref.dtype)


def pallas_linear(x2d, w, b, *, tm=256, tn=256, tk=512):
    M, K = x2d.shape
    Kw, Nout = w.shape
    assert Kw == K and b.shape == (Nout,)
    bm = _pick_tile(M, tm, 8)
    bn = _pick_tile(Nout, tn, 128)
    bk = _pick_tile(K, tk, 128)
    grid = (M // bm, Nout // bn, K // bk)
    itemsize = jnp.dtype(x2d.dtype).itemsize
    cost = pl.CostEstimate(
        flops=2 * M * Nout * K,
        transcendentals=0,
        bytes_accessed=itemsize * (M * K + K * Nout + M * Nout + Nout),
    )
    return pl.pallas_call(
        _linear_kernel,
        out_shape=jax.ShapeDtypeStruct((M, Nout), x2d.dtype),
        grid=grid,
        in_specs=[
            pl.BlockSpec((bm, bk), lambda i, j, k: (i, k)),
            pl.BlockSpec((bk, bn), lambda i, j, k: (k, j)),
            pl.BlockSpec((1, bn), lambda i, j, k: (0, j)),
        ],
        out_specs=pl.BlockSpec((bm, bn), lambda i, j, k: (i, j)),
        scratch_shapes=[pltpu.VMEM((bm, bn), jnp.float32)],
        compiler_params=pltpu.CompilerParams(
            dimension_semantics=("parallel", "parallel", "arbitrary"),
            vmem_limit_bytes=_VMEM_LIMIT_BYTES),
        cost_estimate=cost,
    )(x2d, w, b.reshape(1, Nout))


# ---------------------------------------------------------------------------
# Flash attention: online softmax over kv tiles, heads split via BlockSpec
# ---------------------------------------------------------------------------
def _flash_attn_kernel(q_ref, k_ref, v_ref, o_ref, m_sc, l_sc, acc_sc, *,
                       scale, causal):
    # q_ref: (blk_q, H, Dh); k_ref / v_ref: (blk_k, H, Dh); o_ref: (blk_q, C)
    blk_q, H, Dh = q_ref.shape
    blk_k = k_ref.shape[0]
    qi = pl.program_id(1)
    ki = pl.program_id(2)

    @pl.when(ki == 0)
    def _init():
        m_sc[...] = jnp.full_like(m_sc, -jnp.inf)
        l_sc[...] = jnp.zeros_like(l_sc)
        acc_sc[...] = jnp.zeros_like(acc_sc)

    def _compute(apply_mask):
        if apply_mask:
            row = qi * blk_q + lax.broadcasted_iota(jnp.int32, (blk_q, blk_k), 0)
            col = ki * blk_k + lax.broadcasted_iota(jnp.int32, (blk_q, blk_k), 1)
            keep = col <= row
        for h in range(H):                        # static unroll over heads
            # Fold the softmax scale into q (cheaper than scaling the score tile).
            q = q_ref[:, h, :] * scale            # (blk_q, Dh)
            k = k_ref[:, h, :]                    # (blk_k, Dh)
            v = v_ref[:, h, :]                    # (blk_k, Dh)
            # Contract q/k on Dh directly -- no k.T materialization.
            s = lax.dot_general(q, k, (((1,), (1,)), ((), ())),
                                preferred_element_type=jnp.float32)
            if apply_mask:
                s = jnp.where(keep, s, -jnp.inf)
            m_prev = m_sc[h]                      # (blk_q, 1)
            m_new = jnp.maximum(m_prev, jnp.max(s, axis=-1, keepdims=True))
            alpha = jnp.exp(m_prev - m_new)
            p = jnp.exp(s - m_new)                # unnormalized probs (f32)
            l_sc[h] = alpha * l_sc[h] + jnp.sum(p, axis=-1, keepdims=True)
            acc_sc[h] = alpha * acc_sc[h] + jnp.dot(
                p.astype(v.dtype), v, preferred_element_type=jnp.float32)
            m_sc[h] = m_new

    if causal:
        q_first = qi * blk_q
        q_last = qi * blk_q + blk_q - 1
        k_first = ki * blk_k
        k_last = ki * blk_k + blk_k - 1

        # Tiles fully below/on the diagonal: no masking work at all.
        @pl.when(k_last <= q_first)
        def _unmasked():
            _compute(apply_mask=False)

        # Tiles straddling the diagonal: masked path.
        @pl.when(jnp.logical_and(k_first <= q_last, k_last > q_first))
        def _masked():
            _compute(apply_mask=True)

        # Tiles fully above the diagonal are skipped entirely.
    else:
        _compute(apply_mask=False)

    @pl.when(ki == pl.num_programs(2) - 1)
    def _finalize():
        # Normalize once after the PV matmul instead of dividing the full score tile.
        for h in range(H):
            inv_l = pl.reciprocal(l_sc[h], approx=False)
            o_ref[:, h * Dh:(h + 1) * Dh] = (acc_sc[h] * inv_l).astype(o_ref.dtype)


def pallas_flash_attention(qkv, *, scale, causal, out_dtype, tq=256, tkv=256):
    B, N, three, H, Dh = qkv.shape
    assert three == 3
    C = H * Dh
    bq = _pick_tile(N, tq, 8)
    bk = _pick_tile(N, tkv, 8)
    grid = (B, N // bq, N // bk)
    itemsize = jnp.dtype(qkv.dtype).itemsize
    flops = 4 * B * H * N * N * Dh
    trans = B * H * N * N
    if causal:
        flops //= 2
        trans //= 2
    cost = pl.CostEstimate(
        flops=flops,
        transcendentals=trans,
        bytes_accessed=itemsize * (3 * B * N * C + B * N * C),
    )
    return pl.pallas_call(
        partial(_flash_attn_kernel, scale=scale, causal=causal),
        out_shape=jax.ShapeDtypeStruct((B, N, C), out_dtype),
        grid=grid,
        in_specs=[
            # q / k / v sliced straight out of the (B, N, 3, H, Dh) qkv tensor.
            pl.BlockSpec((None, bq, None, H, Dh), lambda b, i, j: (b, i, 0, 0, 0)),
            pl.BlockSpec((None, bk, None, H, Dh), lambda b, i, j: (b, j, 1, 0, 0)),
            pl.BlockSpec((None, bk, None, H, Dh), lambda b, i, j: (b, j, 2, 0, 0)),
        ],
        # Lane-dense output written directly in (B, N, C) layout.
        out_specs=pl.BlockSpec((None, bq, C), lambda b, i, j: (b, i, 0)),
        scratch_shapes=[
            pltpu.VMEM((H, bq, 1), jnp.float32),    # running max m
            pltpu.VMEM((H, bq, 1), jnp.float32),    # running sum l
            pltpu.VMEM((H, bq, Dh), jnp.float32),   # output accumulator
        ],
        compiler_params=pltpu.CompilerParams(
            dimension_semantics=("parallel", "parallel", "arbitrary"),
            vmem_limit_bytes=_VMEM_LIMIT_BYTES),
        cost_estimate=cost,
    )(qkv, qkv, qkv)


# ---------------------------------------------------------------------------
# Full forward
# ---------------------------------------------------------------------------
def self_attention_forward(x, w_qkv, b_qkv, w_proj, b_proj, *, num_heads,
                           causal=False, attn_tiles=(256, 256),
                           linear_tiles=(256, 256, 512)):
    """Equivalent to SelfAttention.forward (qkv_norm=False, attn_drop=0)."""
    B, N, C = x.shape
    H = num_heads
    assert C % H == 0
    Dh = C // H
    scale = Dh ** (-0.5)   # xformers memory_efficient_attention default scale
    tm, tn, tk = linear_tiles
    tq, tkv = attn_tiles

    # qkv projection; (B*N, 3C) -> (B, N, 3, H, Dh) is a free (no-transpose) reshape.
    qkv = pallas_linear(x.reshape(B * N, C), w_qkv, b_qkv, tm=tm, tn=tn, tk=tk)
    qkv = qkv.reshape(B, N, 3, H, Dh)

    # TODO(synk): qkv_norm=True branch (per-head LayerNorm on q/k) not implemented;
    # the default constructor disables it.

    # Flash attention; heads are split inside the kernel via BlockSpec index maps
    # and the output comes back already in (B, N, C) layout.
    attn = pallas_flash_attention(qkv, scale=scale, causal=causal,
                                  out_dtype=x.dtype, tq=tq, tkv=tkv)

    # output projection
    out = pallas_linear(attn.reshape(B * N, C), w_proj, b_proj,
                        tm=tm, tn=tn, tk=tk).reshape(B, N, C)
    return out


# ---------------------------------------------------------------------------
# Reference (pure JAX) for a correctness check
# ---------------------------------------------------------------------------
def reference_forward(x, w_qkv, b_qkv, w_proj, b_proj, *, num_heads, causal=False):
    B, N, C = x.shape
    H = num_heads
    Dh = C // H
    scale = Dh ** (-0.5)
    qkv = (x @ w_qkv + b_qkv).reshape(B, N, 3, H, Dh)
    q, k, v = qkv[:, :, 0], qkv[:, :, 1], qkv[:, :, 2]
    s = jnp.einsum("bnhd,bmhd->bhnm", q, k) * scale
    if causal:
        mask = jnp.tril(jnp.ones((N, N), bool))
        s = jnp.where(mask, s, -jnp.inf)
    p = jax.nn.softmax(s, axis=-1)
    o = jnp.einsum("bhnm,bmhd->bnhd", p, v).reshape(B, N, C)
    return o @ w_proj + b_proj


# ---------------------------------------------------------------------------
# Main
# ---------------------------------------------------------------------------
if __name__ == "__main__":
    B, N, C, H = 2, 16, 32, 8   # head_dim = 4

    key = jax.random.PRNGKey(0)
    kx, kqkv, kproj, kbias = jax.random.split(key, 4)

    x = jax.random.normal(kx, (B, N, C), dtype=jnp.float32)
    w_qkv = jax.random.normal(kqkv, (C, 3 * C), dtype=jnp.float32) * 0.05
    b_qkv = jnp.zeros((3 * C,), dtype=jnp.float32)          # qkv_bias=False
    w_proj = jax.random.normal(kproj, (C, C), dtype=jnp.float32) * 0.05
    b_proj = jax.random.normal(kbias, (C,), dtype=jnp.float32) * 0.01

    # Small tiles so the flash kv loop, the causal tile-classification (skip /
    # unmasked / masked), and the tiled linear grid are all exercised at these
    # toy shapes.
    tiles = dict(attn_tiles=(8, 8), linear_tiles=(16, 256, 512))

    for causal in (False, True):
        out = self_attention_forward(
            x, w_qkv, b_qkv, w_proj, b_proj, num_heads=H, causal=causal, **tiles)
        out = jax.block_until_ready(out)
        ref = reference_forward(
            x, w_qkv, b_qkv, w_proj, b_proj, num_heads=H, causal=causal)
        assert out.shape == (B, N, C)
        assert jnp.allclose(out, ref, atol=1e-4, rtol=1e-4), \
            f"Pallas output mismatch (causal={causal})"

    print("KERNEL_OK")
</pallas_src>

<mosaic_0001>
module attributes {stable_mosaic.version = 11 : i64} {
  func.func @_linear_kernel(%arg0: i32, %arg1: i32, %arg2: i32, %arg3: memref<16x32xf32, #tpu.memory_space<vmem>>, %arg4: memref<32x96xf32, #tpu.memory_space<vmem>>, %arg5: memref<1x96xf32, #tpu.memory_space<vmem>>, %arg6: memref<16x96xf32, #tpu.memory_space<vmem>>, %arg7: memref<16x96xf32, #tpu.memory_space<vmem>>) attributes {dimension_semantics = [#tpu.dimension_semantics<parallel>, #tpu.dimension_semantics<parallel>, #tpu.dimension_semantics<arbitrary>], iteration_bounds = array<i64: 2, 1, 1>, scalar_prefetch = 0 : i64, scratch_operands = 1 : i64, tpu.core_type = #tpu.core_type<tc>, window_params = [{transform_indices = @transform_0, window_bounds = array<i64: 16, 32>}, {transform_indices = @transform_1, window_bounds = array<i64: 32, 96>}, {transform_indices = @transform_2, window_bounds = array<i64: 1, 96>}, {transform_indices = @transform_3, window_bounds = array<i64: 16, 96>}]} {
    %c0_i32 = arith.constant 0 : i32
    %0 = arith.cmpi eq, %arg2, %c0_i32 : i32
    %1 = arith.extui %0 : i1 to i32
    %c0_i32_0 = arith.constant 0 : i32
    %2 = arith.cmpi ne, %1, %c0_i32_0 : i32
    scf.if %2 {
      %cst_10 = arith.constant 0.000000e+00 : f32
      %12 = vector.broadcast %cst_10 : f32 to vector<16x96xf32>
      %c0_11 = arith.constant 0 : index
      %c0_12 = arith.constant 0 : index
      %13 = vector.load %arg7[%c0_11, %c0_12] : memref<16x96xf32, #tpu.memory_space<vmem>>, vector<16x96xf32>
      tpu.vector_store %arg7[%c0_11, %c0_12], %12 {strides = array<i32>} : memref<16x96xf32, #tpu.memory_space<vmem>>, vector<16x96xf32>,
    } else {
    }
    %c0 = arith.constant 0 : index
    %c0_1 = arith.constant 0 : index
    %3 = vector.load %arg7[%c0, %c0_1] : memref<16x96xf32, #tpu.memory_space<vmem>>, vector<16x96xf32>
    %c0_2 = arith.constant 0 : index
    %c0_3 = arith.constant 0 : index
    %4 = vector.load %arg3[%c0_2, %c0_3] : memref<16x32xf32, #tpu.memory_space<vmem>>, vector<16x32xf32>
    %c0_4 = arith.constant 0 : index
    %c0_5 = arith.constant 0 : index
    %5 = vector.load %arg4[%c0_4, %c0_5] : memref<32x96xf32, #tpu.memory_space<vmem>>, vector<32x96xf32>
    %cst = arith.constant dense<0.000000e+00> : vector<16x96xf32>
    %6 = tpu.matmul %4, %5, %cst {dimension_numbers = #tpu.dot_dimension_numbers<[1], [0], [0], [1], [0, 0, 1, 1], [], []>} : vector<16x32xf32>, vector<32x96xf32>, vector<16x96xf32> -> vector<16x96xf32>
    %7 = arith.addf %3, %6 : vector<16x96xf32>
    %c0_6 = arith.constant 0 : index
    %c0_7 = arith.constant 0 : index
    %8 = vector.load %arg7[%c0_6, %c0_7] : memref<16x96xf32, #tpu.memory_space<vmem>>, vector<16x96xf32>
    tpu.vector_store %arg7[%c0_6, %c0_7], %7 {strides = array<i32>} : memref<16x96xf32, #tpu.memory_space<vmem>>, vector<16x96xf32>,
    %c0_i32_8 = arith.constant 0 : i32
    %9 = arith.cmpi eq, %arg2, %c0_i32_8 : i32
    %10 = arith.extui %9 : i1 to i32
    %c0_i32_9 = arith.constant 0 : i32
    %11 = arith.cmpi ne, %10, %c0_i32_9 : i32
    scf.if %11 {
      %c0_10 = arith.constant 0 : index
      %c0_11 = arith.constant 0 : index
      %12 = vector.load %arg7[%c0_10, %c0_11] : memref<16x96xf32, #tpu.memory_space<vmem>>, vector<16x96xf32>
      %c0_12 = arith.constant 0 : index
      %c0_13 = arith.constant 0 : index
      %13 = vector.load %arg5[%c0_12, %c0_13] : memref<1x96xf32, #tpu.memory_space<vmem>>, vector<1x96xf32>
      %14 = vector.broadcast %13 : vector<1x96xf32> to vector<16x96xf32>
      %15 = arith.addf %12, %14 : vector<16x96xf32>
      %c0_14 = arith.constant 0 : index
      %c0_15 = arith.constant 0 : index
      %16 = vector.load %arg6[%c0_14, %c0_15] : memref<16x96xf32, #tpu.memory_space<vmem>>, vector<16x96xf32>
      tpu.vector_store %arg6[%c0_14, %c0_15], %15 {strides = array<i32>} : memref<16x96xf32, #tpu.memory_space<vmem>>, vector<16x96xf32>,
    } else {
    }
    return
  }
  func.func @transform_0(%arg0: i32, %arg1: i32, %arg2: i32) -> (i32, i32) {
    %c0_i32 = arith.constant 0 : i32
    return %arg0, %arg2 : i32, i32
  }
  func.func @transform_1(%arg0: i32, %arg1: i32, %arg2: i32) -> (i32, i32) {
    %c0_i32 = arith.constant 0 : i32
    return %arg2, %arg1 : i32, i32
  }
  func.func @transform_2(%arg0: i32, %arg1: i32, %arg2: i32) -> (i32, i32) {
    %c0_i32 = arith.constant 0 : i32
    %c0_i32_0 = arith.constant 0 : i32
    return %c0_i32, %arg1 : i32, i32
  }
  func.func @transform_3(%arg0: i32, %arg1: i32, %arg2: i32) -> (i32, i32) {
    %c0_i32 = arith.constant 0 : i32
    return %arg0, %arg1 : i32, i32
  }
}

</mosaic_0001>

<bundles_post_ra>
// kernel: tpu_custom_call.1
= control target key start
LH: loop header
LB: loop body
LE: loop exit
PB: predicated region body
PF: predicated region fallthrough
CT: control target
= control target key end

     0   :  { %8 = vsyncpa [#allocation4], 0  ;;  %s1041_s0 = inlined_call_operand.hbm [shape: f32[32,32], index: 0, kind: input, shape index: {}]   ;;  %s1042_s1 = inlined_call_operand.hbm [shape: f32[32,96], index: 1, kind: input, shape index: {}]   ;;  %s1043_s2 = inlined_call_operand.vmem [shape: f32[1,96], index: 2, kind: input, shape index: {}]   ;;  %s1044_s3 = inlined_call_operand.hbm [shape: f32[32,96], index: 3, kind: output, shape index: {}]  }
   0x1   :  { %10 = vsyncpa [#allocation4 + $0x1], 0 }
   0x2   :  { %11 = vsyncpa [#allocation7], 0 }
   0x3   :  { %12 = vsyncpa [#allocation5], 0 }
   0x4   :  { %14 = vsyncpa [#allocation5 + $0x1], 0  ;;  %s803_s12 = smov 0   ;;  %s805_s13 = smov 0  }
   0x5   :  { %s807_s14 = smov 0   ;;  %s809_s15 = smov 0  }
   0x6   :  { %s811_s16 = smov 0   ;;  %s813_s17 = smov 0  }
   0x7 LB: > { %s503_s18 = sadd.s32 4294967295, %s773_s17   ;;  %s504_s19 = sadd.s32 4294967294, %s773_s17   ;;  %s773_s17 = sphi %s813_s17, %s20_s17   ;;  %s769_s16 = sphi %s811_s16, %s1068_s16   ;;  %s765_s15 = sphi %s809_s15, %s1067_s15   ;;  %s761_s14 = sphi %s807_s14, %s1066_s14   ;;  %s757_s13 = sphi %s805_s13, %s1065_s13   ;;  %s753_s12 = sphi %s803_s12, %s1064_s12  }
   0x8   : > { %p61_p0 = scmp.ne.s32.totalorder %s757_s13, %s753_s12  ;;  %p837_p1 = scmp.eq.s32.totalorder %s503_s18, 0 }
   0x9   : > { %p841_p2 = scmp.eq.s32.totalorder %s503_s18, 1  ;;  %p147_p3 = scmp.eq.s32.totalorder %s504_s19, 1 }
   0xa   : > { %s1049_s20 = scalar_select %p837_p1, 1, 0 }
   0xb   : > { %s1050_s21 = scalar_select %p841_p2, 1, 0 }
   0xc   : > { %p847_p4 = por %p837_p1, %p61_p0  ;;  %p505_p5 = scmp.ge.s32.totalorder %s773_s17, 1 }
   0xd   : > { %p852_p6 = por %p147_p3, %p61_p0  ;;  %p154_p7 = scmp.lt.s32.totalorder %s773_s17, 3 }
   0xe   : > { %s1051_s22 = scalar_select %p847_p4, 1, 0 }
   0xf   : > { %s1052_s23 = scalar_select %p852_p6, 1, 0 }
  0x10   : > { %p857_p8 = pnand %p505_p5, %p154_p7  ;;  %s775_s25 = smov [#allocation6]  }
  0x11   : > { %s170_s26 = sshll.u32 %s775_s25, 4  ;;  %s39_s28 = sadd.s32 1, %s769_s16  ;;  %s171_s26 = int_to_ptr.vmem [resolvable:$true] %s170_s26 }
  0x12   : > { %s1053_s24 = scalar_select %p857_p8, 1, 0 }
  0x13   : > { %p559_p9 = pneg %p857_p8  ;;  %s629_s4 = scalar_lea.hbm %s1042_s1, 512 }
  0x14   : > { %p630_p12 = scmp.ne.s32.totalorder %s1042_s1, %s629_s4  ;;  %p636_p5 = scmp.lt.u32.totalorder %s629_s4, %s1042_s1 }
  0x15   : > { %p866_p11 = pnand %p559_p9, %p837_p1 }
  0x17   : > { %p631_p13 = pneg %p866_p11 }
  0x19   : > { %p632_p0 = pnand %p631_p13, %p630_p12 }
  0x1b   : > { %p633_p3 = pneg %p632_p0 }
  0x1d   : > { %p638_p7 = pnand %p636_p5, %p633_p3 }
  0x1f   : > { %641 = shalt.err (!%p638_p7)
}
  0x20   : > { %s642_s9 = scalar_lea.vmem %s171_s26, 512  ;;  %p650_p1 = scmp.lt.s32.totalorder %s171_s26, %s171_s26 }
  0x21   : > { %p643_p9 = scmp.ne.s32.totalorder %s171_s26, %s642_s9  ;;  %p651_p4 = scmp.lt.s32.totalorder %s642_s9, %s642_s9 }
  0x23   : > { %p645_p10 = pnand %p643_p9, %p631_p13  ;;  %p652_p8 = por %p651_p4, %p650_p1 }
  0x25   : > { %p646_p6 = pneg %p645_p10 }
  0x27   : > { %p653_p2 = pnand %p652_p8, %p646_p6 }
  0x29   : > { %656 = shalt.err (!%p653_p2)
}
  0x2a   : > { %s776_s10 = smov 128   ;;  %s777_s11 = smov 8  }
  0x2b   : > { %562 = dma.hbm_to_vmem [thread:$0]  (!%p866_p11), %s1042_s1, 512, %s171_s26, [#allocation7], %s776_s10, %s776_s10, %s777_s11  }
  0x2c   : > { %p41_p1 = scmp.ge.s32.totalorder %s39_s28, 2  ;;  %s48_s25 = sadd.s32 1, %s761_s14 }
  0x2d   : > { %p55_p2 = scmp.ne.s32.totalorder %s761_s14, %s757_s13  ;;  %p56_p4 = scmp.eq.s32.totalorder %s773_s17, 0 }
  0x2e   : > { %s1070_s28 = smov (%p41_p1, %s39_s28), 0  ;;  %p1056_p8 = scmp.ne.s32.totalorder %s1050_s21, 0 }
  0x2f   : > { %p896_p6 = por %p56_p4, %p55_p2  ;;  %s43_s30 = ssub.s32 %s769_s16, %s1070_s28 }
  0x30   : > { %p902_p10 = por %p1056_p8, %p55_p2  ;;  %p572_p12 = scmp.lt.s32.totalorder %s773_s17, 2 }
  0x31   : > { %p46_p11 = scmp.eq.s32.totalorder %s43_s30, 0  ;;  %s190_s26 = sand.u32 1, %s761_s14  }
  0x32   : > { %s509_s4 = sshll.u32 %s190_s26, 4  ;;  %s524_s6 = sshll.u32 %s769_s16, 8 }
  0x33   : > { %s911_s5 = scalar_select %p46_p11, %s761_s14, %s48_s25  }
  0x34   : > { %s917_s9 = scalar_lea.hbm %s1041_s0, %s524_s6  ;;  %s194_s21 = scalar_lea.vmem [#allocation3], %s509_s4 }
  0x35   : > { %s202_s18 = sshll.u32 %s194_s21, 4  ;;  %p923_p13 = pnand %p572_p12, %p896_p6  ;;  %s919_s18 = int_to_ptr.vmem [resolvable:$true] %s202_s18 }
  0x36   : > { %s927_s25 = scalar_lea.sflag [#allocation4], %s190_s26  ;;  %s657_s30 = scalar_lea.hbm %s917_s9, 256 }
  0x37   : > { %p658_p0 = scmp.ne.s32.totalorder %s917_s9, %s657_s30  ;;  %p659_p3 = pneg %p923_p13 }
  0x38   : > { %s662_s29 = scalar_lea.hbm %s1041_s0, 512  ;;  %p663_p9 = scmp.lt.u32.totalorder %s917_s9, %s1041_s0 }
  0x39   : > { %p660_p5 = pnand %p659_p3, %p658_p0  ;;  %p664_p1 = scmp.lt.u32.totalorder %s662_s29, %s657_s30 }
  0x3a   : > { %p666_p4 = scmp.lt.u32.totalorder %s657_s30, %s917_s9 }
  0x3b   : > { %p661_p7 = pneg %p660_p5  ;;  %p665_p2 = por %p664_p1, %p663_p9 }
  0x3d   : > { %p667_p6 = por %p666_p4, %p665_p2 }
  0x3f   : > { %p668_p8 = pnand %p667_p6, %p661_p7 }
  0x41   : > { %671 = shalt.err (!%p668_p8)
}
  0x42   : > { %s672_s26 = scalar_lea.vmem %s919_s18, 256  ;;  %s778_s21 = smov [#allocation3]  }
  0x43   : > { %p673_p12 = scmp.ne.s32.totalorder %s919_s18, %s672_s26  ;;  %s677_s4 = sshll.u32 %s778_s21, 4  ;;  %s678_s4 = int_to_ptr.vmem [resolvable:$false] %s677_s4 }
  0x44   : > { %s679_s6 = scalar_lea.vmem %s678_s4, 512  ;;  %p680_p5 = scmp.lt.s32.totalorder %s919_s18, %s678_s4 }
  0x45   : > { %p675_p11 = pnand %p673_p12, %p659_p3  ;;  %p681_p9 = scmp.lt.s32.totalorder %s679_s6, %s672_s26 }
  0x47   : > { %p676_p0 = pneg %p675_p11  ;;  %p682_p1 = por %p681_p9, %p680_p5 }
  0x49   : > { %p683_p2 = pnand %p682_p1, %p676_p0 }
  0x4b   : > { %686 = shalt.err (!%p683_p2)
}
  0x4c   : > { %566 = dma.hbm_to_vmem [thread:$0]  (!%p923_p13), %s917_s9, 256, %s919_s18, %s927_s25, %s776_s10, %s776_s10, %s777_s11  }
  0x4d   : > { %p1059_p3 = scmp.ne.s32.totalorder %s1053_s24, 0 }
  0x4e   : > { %s961_s30 = sand.u32 (!%p1059_p3), 1, %s757_s13   ;;  %p1060_p7 = scmp.ne.s32.totalorder (!%p1059_p3), %s1051_s22, 0 }
  0x4f   : > { %214 = sbr.rel (%p1059_p3) target bundleno = 342 (0x156), region = 32  ;;  %s513_s29 = sshll.u32 (!%p1059_p3), %s961_s30, 4 }
  0x50   : > { %s217_s7 = scalar_lea.sflag (!%p1059_p3), [#allocation4], %s961_s30  ;;  %s220_s19 = scalar_lea.vmem (!%p1059_p3), [#allocation3], %s513_s29 }
  0x56   : > { %740 = dma.done.wait (%p1060_p7), %s217_s7, 256  }
  0x57   : > { %742 = vsyncadd (%p1060_p7), %s217_s7, 4294967040  ;;  %p1061_p13 = scmp.ne.s32.totalorder %s1049_s20, 0 }
  0x59   : > { %744 = dma.done.wait (%p1061_p13), [#allocation7], 512  }
  0x5a   : > { %746 = vsyncadd (%p1061_p13), [#allocation7], 4294966784  ;;  %vm260_vm0 = vcmask 785408   ;;  %v779_v0 = vmov 0.0   ;;  %vm271_vm1 = vcmask 261120   ;;  %v267_v1 = vld [vmem:[#allocation6] sm:$0xff] }
  0x5b   : > { %262 = vst.msk [vmem:[#allocation2 + $0x8] sm:$0xff] %vm260_vm0, %v779_v0  ;;  %261 = vst.msk [vmem:[#allocation2] sm:$0xff] %vm260_vm0, %v779_v0  ;;  %v268_v2 = vld [vmem:[#allocation6 + $0x8] sm:$0xff]  ;;  %v269_v3 = vld [vmem:[#allocation6 + $0x10] sm:$0xff]  ;;  %s525_s24 = sshll.u32 %s765_s15, 8  ;;  %s249_s10 = scalar_lea.vmem [#allocation8], %s513_s29 }
  0x5c   : > { %v543_v4 = vpack.c.bf16 %v268_v2, %v267_v1  ;;  %v270_v5 = vld [vmem:[#allocation6 + $0x18] sm:$0xff]  ;;  %v265_v6 = vld [vmem:[%s220_s19] sm:$0xff]  ;;  %s389_s11 = sshll.u32 %s249_s10, 4  ;;  %s988_s25 = scalar_lea.hbm %s1044_s3, %s525_s24  ;;  %s990_s11 = int_to_ptr.vmem [resolvable:$true] %s389_s11 }
  0x5d   : > { %v547_v7 = vpack.c.bf16 %v270_v5, %v269_v3  ;;  %540 = vmatprep.mubr.msk.f32.mxu0 %vm271_vm1, %v265_v6  ;;  %v266_v8 = vld [vmem:[%s220_s19 + $0x8] sm:$0xff]  ;;  %v518_v15 = vld [vmem:[%s1043_s2] ss:$0 sm:$0xff]  ;;  %s375_s15 = scalar_lea.sflag [#allocation5], %s961_s30  ;;  %s687_s8 = scalar_lea.vmem %s990_s11, 256 }
  0x5e   : > { %544 = vmatprep.subr.bf16.mxu0 %v543_v4  ;;  %p688_p4 = scmp.ne.s32.totalorder %s990_s11, %s687_s8  ;;  %s780_s26 = smov [#allocation8]  }
  0x5f   : > { %546 = vmatpush3.bf16.msra.mxu0 %v543_v4  ;;  %s691_s21 = sshll.u32 %s780_s26, 4  ;;  %s692_s21 = int_to_ptr.vmem [resolvable:$false] %s691_s21 }
  0x60   : > { %548 = vmatprep.subr.bf16.mxu0 %v547_v7  ;;  %p689_p6 = pnand %p688_p4, %p902_p10  ;;  %s693_s4 = scalar_lea.vmem %s692_s21, 512 }
  0x61   : > { %p694_p12 = scmp.lt.s32.totalorder %s990_s11, %s692_s21  ;;  %p695_p11 = scmp.lt.s32.totalorder %s693_s4, %s687_s8 }
  0x62   : > { %v264_v9 = vld [vmem:[#allocation2 + $0x8] sm:$0xff]  ;;  %v263_v10 = vld [vmem:[#allocation2] sm:$0xff]  ;;  %p690_p8 = pneg %p689_p6 }
  0x63   : > { %550 = vmatpush3.bf16.msra.mxu0 %v547_v7  ;;  %p696_p0 = por %p695_p11, %p694_p12 }
  0x65   : > { %p697_p5 = pnand %p696_p0, %p690_p8 }
  0x66   : > { %541 = vmatmul.mubr.msk.f32.vlgmr.msra.gmra.mrb[0].mxu0 %vm271_vm1, %v266_v8 }
 0x139   : > { %v542_v11 = vpop.f32.mrb[0].mxu0 }
 0x13a   : > { %v354_v12 = vadd.f32 %v542_v11, %v264_v9  ;;  %v344_v13 = vpop.f32.mrb[1].mxu0 }
 0x13b   : > { %v353_v14 = vadd.f32 %v344_v13, %v263_v10 }
 0x13c   : > { %357 = vst.msk [vmem:[#allocation2 + $0x8] sm:$0xff] %vm260_vm0, %v354_v12 }
 0x13d   : > { %356 = vst.msk [vmem:[#allocation2] sm:$0xff] %vm260_vm0, %v353_v14 }
 0x143   : > { %v362_v16 = vld [vmem:[#allocation2 + $0x8] sm:$0xff] }
 0x144   : > { %v361_v17 = vld [vmem:[#allocation2] sm:$0xff]  ;;  %v371_v18 = vadd.f32 %v518_v15, %v362_v16 }
 0x145   : > { %v370_v19 = vadd.f32 %v518_v15, %v361_v17 }
 0x146   : > { %373 = vst.msk [vmem:[%s249_s10 + $0x8] sm:$0xff] %vm260_vm0, %v371_v18 }
 0x147   : > { %372 = vst.msk [vmem:[%s249_s10] sm:$0xff] %vm260_vm0, %v370_v19 }
 0x148   : > { %700 = shalt.err (!%p697_p5)
}
 0x149   : > { %s701_s6 = scalar_lea.hbm %s988_s25, 256  ;;  %s705_s19 = scalar_lea.hbm %s1044_s3, 512 }
 0x14a   : > { %p702_p9 = scmp.ne.s32.totalorder %s988_s25, %s701_s6  ;;  %p706_p3 = scmp.lt.u32.totalorder %s988_s25, %s1044_s3 }
 0x14b   : > { %p707_p7 = scmp.lt.u32.totalorder %s705_s19, %s701_s6  ;;  %p709_p4 = scmp.lt.u32.totalorder %s701_s6, %s988_s25 }
 0x14c   : > { %p703_p1 = pnand %p702_p9, %p902_p10 }
 0x14d   : > { %p708_p13 = por %p707_p7, %p706_p3 }
 0x14e   : > { %p704_p2 = pneg %p703_p1 }
 0x14f   : > { %p710_p6 = por %p709_p4, %p708_p13 }
 0x151   : > { %p711_p8 = pnand %p710_p6, %p704_p2 }
 0x153   : > { %714 = shalt.err (!%p711_p8)
}
 0x154   : > { %s781_s24 = smov 128   ;;  %s782_s10 = smov 8  }
 0x155   : > { %557 = dma.vmem_to_hbm [thread:$0]  (%p902_p10), %s990_s11, 256, %s988_s25, %s375_s15, %s781_s24, %s781_s24, %s782_s10  }
 0x156 PF: > { %s404_s9 = sand.u32 1, %s753_s12   ;;  %p1062_p12 = scmp.ne.s32.totalorder %s1052_s23, 0 }
 0x157   : > { %p1063_p11 = scmp.ge.s32.totalorder %s773_s17, 2  ;;  %s405_s18 = scalar_lea.sflag [#allocation5], %s404_s9 }
 0x159   : > { %p568_p0 = pnand %p1063_p11, %p1062_p12 }
 0x15b   : > { %748 = dma.done.wait (!%p568_p0), %s405_s18, 256  }
 0x15c   : > { %750 = vsyncadd (!%p568_p0), %s405_s18, 4294967040  ;;  %s20_s17 = sadd.s32 1, %s773_s17   ;;  %s1064_s12 = smov %s757_s13 }
 0x15d   : > { %p17_p5 = scmp.ge.s32.totalorder %s20_s17, 4   ;;  %s1065_s13 = smov %s761_s14 }
 0x15e   : > { %s1066_s14 = smov %s911_s5  ;;  %s1067_s15 = smov %s769_s16 }
 0x15f   : > { %s1068_s16 = smov %s1070_s28  ;;  %19 = sbr.rel (!%p17_p5) target bundleno = 7 (0x7), region = 93 }
 0x166   :  { %410 = vsyncpa [#allocation4], 1 }
 0x167   :  { %412 = vsyncpa [#allocation4 + $0x1], 1 }
 0x168   :  { %413 = vsyncpa [#allocation7], 1 }
 0x169   :  { %414 = vsyncpa [#allocation5], 1 }
 0x16a   :  { %416 = vsyncpa [#allocation5 + $0x1], 1 }

</bundles_post_ra>
